<compile_context>
chip_gen: v7x
topology: tpu7x:2x2x1
jax: 0.10.0
libtpu: 0.0.40
codegen_flags: <defaults>
</compile_context>

<pallas_src>
import functools

import jax
import jax.numpy as jnp
import numpy as np
from jax.experimental import pallas as pl
from jax.experimental.pallas import tpu as pltpu

LANE = 128
COL_CAP = 8192                  # max lane-axis elements folded into one block
SMALL_ROW_SLAB = 512 << 10      # below this, absorb a restricted dim into the row window


def _cdiv(a, b):
    return -(-a // b)


def _round_up(v, m):
    return ((v + m - 1) // m) * m


def _divisors(v):
    ds, i = [], 1
    while i * i <= v:
        if v % i == 0:
            ds.append(i)
            if i != v // i:
                ds.append(v // i)
        i += 1
    return sorted(ds)


def _normalize_index(idx, shape):
    """Static index expression -> per-dim (start, size, keep)."""
    if not isinstance(idx, tuple):
        idx = (idx,)
    n = len(shape)
    n_ell = sum(1 for e in idx if e is Ellipsis)
    assert n_ell <= 1, "at most one Ellipsis allowed"
    n_expl = len(idx) - n_ell
    assert n_expl <= n, "too many indices for tensor"

    expanded = []
    for e in idx:
        if e is Ellipsis:
            expanded.extend([slice(None)] * (n - n_expl))
        else:
            expanded.append(e)
    expanded.extend([slice(None)] * (n - len(expanded)))

    per_dim = []
    for e, d in zip(expanded, shape):
        if isinstance(e, (int, np.integer)):
            s = int(e) + d if int(e) < 0 else int(e)
            assert 0 <= s < d, f"index {e} out of range for dim {d}"
            per_dim.append((s, 1, False))                 # int index: dim dropped
        elif isinstance(e, slice):
            start, stop, step = e.indices(d)
            assert step == 1, "only unit-step slices supported"
            per_dim.append((start, max(stop - start, 0), True))
        else:
            # TODO(synk): tensor / bool-mask indices, negative-step slices and newaxis
            #             have no static-BlockSpec equivalent and are not supported.
            raise NotImplementedError(f"unsupported index element: {e!r}")
    return per_dim


def _window_copy_kernel(x_ref, o_ref, *, row_slice, col_slice):
    # x_ref: (bt?, rows_in, cols_in) VMEM block; o_ref: (bt?, rows_out, cols_out)
    v = x_ref[...]
    if row_slice is not None:
        v = v[..., row_slice[0]:row_slice[0] + row_slice[1], :]
    if col_slice is not None:
        v = v[..., col_slice[0]:col_slice[0] + col_slice[1]]
    o_ref[...] = v


def index_forward(x, index):
    shape = tuple(int(d) for d in x.shape)
    n = len(shape)
    if n == 0:
        return x

    per_dim = _normalize_index(index, shape)
    starts = [p[0] for p in per_dim]
    sizes = [p[1] for p in per_dim]
    keeps = [p[2] for p in per_dim]
    fulls = [s == 0 and sz == d for (s, sz, _), d in zip(per_dim, shape)]
    out_shape_true = tuple(sz for sz, k in zip(sizes, keeps) if k)

    if any(sz == 0 for sz in sizes):                      # empty slice
        return jnp.zeros(out_shape_true, x.dtype)
    if all(fulls):                                        # identity window: no data movement
        return x.reshape(out_shape_true)

    itemsize = int(jnp.dtype(x.dtype).itemsize)
    sub_mult = max(8, 32 // itemsize)                     # 8 f32 / 16 bf16 / 32 int8

    # per-generation VMEM budget and slab target (v7x: 64 MiB/TC, v5e/v6e: 128 MiB)
    try:
        vmem_cap = int(pltpu.get_tpu_info().vmem_capacity_bytes)
    except Exception:
        vmem_cap = 128 << 20
    vmem_budget = min(max(24 << 20, vmem_cap - (16 << 20)), 112 << 20)
    slab_target = (8 << 20) if vmem_cap >= (96 << 20) else (4 << 20)

    # ---- maximal fully-kept trailing suffix -> (row, lane) split ----
    t = n
    while t > 0 and fulls[t - 1]:
        t -= 1

    if t < n:                                             # fully-kept suffix exists
        F = int(np.prod(shape[t:]))
        cands = [d for d in _divisors(F) if d % LANE == 0 and d <= COL_CAP]
        if cands:
            good = [d for d in cands if F // d >= sub_mult]
            C = max(good) if good else min(cands)
        elif F <= COL_CAP:
            C = F
        else:
            small = [d for d in _divisors(F) if d <= COL_CAP]
            C = max(small) if small else F
        col_full = col_size = C
        col_start = 0
        row_full = F // C
        row_start, row_size = 0, row_full
        p = t - 1
    else:                                                 # last dim restricted
        col_full, col_start, col_size = shape[n - 1], starts[n - 1], sizes[n - 1]
        row_full, row_start, row_size = 1, 0, 1
        p = n - 2

    # merge contiguous fully-kept dims just left of the lane group into the row axis
    while p >= 0 and fulls[p]:
        row_full *= shape[p]
        row_size = row_full
        p -= 1
    # absorb at most one restricted dim into the row *window* (never size-1 int dims)
    if (p >= 0 and not fulls[p] and sizes[p] > 1
            and (row_size < sub_mult
                 or row_size * col_size * itemsize < SMALL_ROW_SLAB)):
        row_start = starts[p] * row_full
        row_size = sizes[p] * row_full
        row_full = shape[p] * row_full
        p -= 1

    n_lead = p + 1
    row_kept_full = (row_start == 0 and row_size == row_full)
    col_kept_full = (col_start == 0 and col_size == col_full)

    # ---- lane (col) axis plan ----
    if col_kept_full:
        col_in_block = col_out_block = col_full
        grid_cols, col_in_off, col_slice = 1, 0, None
    elif col_start % LANE == 0 and col_size >= LANE:
        # aligned window: express directly in the BlockSpec (no read amplification)
        limit = min(COL_CAP, (col_size // LANE) * LANE)
        if col_start > 0:
            col_block = max(d for d in range(LANE, limit + 1, LANE) if col_start % d == 0)
        else:
            col_block = limit
        col_in_block = col_out_block = col_block
        grid_cols = _cdiv(col_size, col_block)
        col_in_off = col_start // col_block
        col_slice = None
    else:
        # misaligned window: full-extent lane block + static in-kernel slice
        col_in_block, col_out_block = col_full, col_size
        grid_cols, col_in_off = 1, 0
        col_slice = (col_start, col_size)

    # ---- row (sublane) axis plan ----
    row_cap = slab_target // max(1, col_in_block * itemsize)
    row_cap = max(sub_mult, min(row_cap, 65536) // sub_mult * sub_mult)
    if row_start % sub_mult == 0 and row_size >= sub_mult:
        row_aligned = True
        limit = min(row_cap, max(sub_mult, (row_size // sub_mult) * sub_mult))
        if row_start > 0:
            row_block = max(d for d in range(sub_mult, limit + 1, sub_mult)
                            if row_start % d == 0)
        else:
            row_block = limit
        row_in_block = row_out_block = row_block
        grid_rows = _cdiv(row_size, row_block)
        row_in_off = row_start // row_block
        row_slice = None
    else:
        row_aligned = False
        row_block = row_full
        row_in_block, row_out_block = row_full, row_size
        grid_rows, row_in_off = 1, 0
        row_slice = None if row_kept_full else (row_start, row_size)

    # ---- leading dims: grid axes (+ block the innermost blockable one) ----
    blocked_dim, bt = -1, 1
    per_step_in_bytes = row_in_block * col_in_block * itemsize
    if n_lead > 0 and per_step_in_bytes < slab_target:
        cap0 = min(max(1, slab_target // max(1, per_step_in_bytes)), 65536)
        for j in range(n_lead - 1, -1, -1):
            cap = min(cap0, sizes[j])
            if cap < 2:
                continue
            if starts[j] == 0:
                c = cap
            else:
                c = 1
                for d in range(cap, 1, -1):               # need bt | start for index_map
                    if starts[j] % d == 0:
                        c = d
                        break
            if c >= 2:
                blocked_dim, bt = j, c
                break

    in_block, out_block, lead_grid = [], [], []
    for j in range(n_lead):
        if j == blocked_dim:
            in_block.append(bt)
            out_block.append(bt)
            lead_grid.append(_cdiv(sizes[j], bt))
        else:
            in_block.append(None)                         # squeezed lead dim
            out_block.append(None)
            lead_grid.append(sizes[j])
    in_block += [row_in_block, col_in_block]
    out_block += [row_out_block, col_out_block]

    grid = tuple(lead_grid) + (grid_rows, grid_cols)
    grid_prod = int(np.prod(grid))
    total_out_bytes = int(np.prod(out_shape_true)) * itemsize if out_shape_true else itemsize

    # large copies should have a few parallel steps (pipeline overlap + both v7x cores)
    if row_aligned and total_out_bytes >= (2 << 20) and grid_prod < 4:
        other = max(1, grid_prod // grid_rows)
        want = _cdiv(4, other)
        nb = max(sub_mult, _round_up(_cdiv(row_size, want), sub_mult))
        if nb < row_block and row_start % nb == 0:
            row_block = nb
            row_in_block = row_out_block = nb
            in_block[-2] = out_block[-2] = nb
            grid_rows = _cdiv(row_size, nb)
            row_in_off = row_start // nb
            grid = tuple(lead_grid) + (grid_rows, grid_cols)
            grid_prod = int(np.prod(grid))

    # ---- index maps (block indices; squeezed lead dims carry element offsets) ----
    lead_starts = tuple(starts[:n_lead])
    blocked_in_off = (starts[blocked_dim] // bt) if blocked_dim >= 0 else 0
    _n_lead, _blocked = n_lead, blocked_dim
    _row_in_off, _col_in_off = row_in_off, col_in_off

    def in_index_map(*g):
        idx = []
        for j in range(_n_lead):
            if j == _blocked:
                idx.append(blocked_in_off + g[j])
            else:
                idx.append(lead_starts[j] + g[j])
        idx.append(_row_in_off + g[_n_lead])
        idx.append(_col_in_off + g[_n_lead + 1])
        return tuple(idx)

    def out_index_map(*g):
        return tuple(g[:_n_lead]) + (g[_n_lead], g[_n_lead + 1])

    # ---- launch ----
    view_shape = tuple(shape[:n_lead]) + (row_full, col_full)
    assert int(np.prod(view_shape)) == int(np.prod(shape)), (view_shape, shape)
    xv = x.reshape(view_shape)

    pallas_out_shape = tuple(sizes[j] for j in range(n_lead)) + (row_size, col_size)

    bt_mul = bt if blocked_dim >= 0 else 1
    in_blk_bytes = bt_mul * row_in_block * col_in_block * itemsize
    out_blk_bytes = bt_mul * row_out_block * col_out_block * itemsize
    needed = 2 * (in_blk_bytes + out_blk_bytes) + (2 << 20)
    vmem_limit = int(max(8 << 20, min(needed, vmem_budget)))
    # TODO(synk): huge *misaligned* row/col windows keep a full-extent fallback block
    #             that cannot be tiled with static BlockSpecs; those may exceed the v7x
    #             VMEM budget and would need a gather-style manual-DMA path.
    # TODO(synk): pipeline_mode=pl.Buffered(3) on the input spec would help sub-1MiB
    #             slabs; left out to keep the lowering conservative.

    cost = pl.CostEstimate(
        flops=0, transcendentals=0,
        bytes_accessed=int(grid_prod * in_blk_bytes
                           + int(np.prod(pallas_out_shape)) * itemsize))

    y = pl.pallas_call(
        functools.partial(_window_copy_kernel, row_slice=row_slice, col_slice=col_slice),
        out_shape=jax.ShapeDtypeStruct(pallas_out_shape, x.dtype),
        grid=grid,
        in_specs=[pl.BlockSpec(tuple(in_block), in_index_map)],
        out_specs=pl.BlockSpec(tuple(out_block), out_index_map),
        compiler_params=pltpu.CompilerParams(
            dimension_semantics=("parallel",) * len(grid),
            vmem_limit_bytes=vmem_limit),
        cost_estimate=cost,
    )(xv)

    return y.reshape(out_shape_true)


class Index:
    """JAX/Pallas port of the PyTorch `Index` module: forward(x) == x[self.shape]."""

    def __init__(self, shape):
        self.shape = shape

    def __call__(self, x):
        return index_forward(x, self.shape)


if __name__ == "__main__":
    key = jax.random.PRNGKey(0)
    k1, k2, k3, k4, k5, k6 = jax.random.split(key, 6)

    x = jax.random.normal(k1, (2, 4, 16, 16), jnp.float32)

    cases = [
        # representative static index expressions `Index(shape)` carries in the model
        (x, (slice(None), 1)),                                    # x[:, 1]
        (x, (slice(None), slice(None), slice(2, 14))),            # x[:, :, 2:14]
        (x, (0, slice(1, 3), slice(None), slice(4, None))),       # x[0, 1:3, :, 4:]
        # lane-aligned window (128-multiple start/size) -> BlockSpec fast path
        (jax.random.normal(k2, (4, 8, 256), jnp.float32),
         (slice(None), slice(2, 6), slice(128, None))),
        # sublane-aligned row window -> pure-copy kernel, no read amplification
        (jax.random.normal(k3, (2, 64, 128), jnp.float32),
         (slice(None), slice(16, 48), slice(None))),
        # non-dividing row tiling (partial edge blocks)
        (jax.random.normal(k4, (2, 100, 128), jnp.float32),
         (slice(None), slice(16, 76), slice(None))),
        # sub-32-bit dtype: 16-row sublane alignment
        (jax.random.normal(k5, (4, 64, 256), jnp.float32).astype(jnp.bfloat16),
         (slice(None), slice(32, 64), slice(None))),
        # 1-D misaligned window
        (jax.random.normal(k6, (1024,), jnp.float32), slice(7, 1000)),
    ]

    for xi, idx in cases:
        fwd = jax.jit(Index(idx))
        y = jax.block_until_ready(fwd(xi))
        ref = xi[idx]                                             # pure-JAX reference
        assert y.shape == ref.shape, (idx, y.shape, ref.shape)
        assert jnp.array_equal(y, ref), f"mismatch for index {idx}"

    print("KERNEL_OK")
</pallas_src>

<mosaic_0001>
module attributes {stable_mosaic.version = 11 : i64} {
  func.func @_window_copy_kernel(%arg0: i32, %arg1: i32, %arg2: i32, %arg3: i32, %arg4: memref<2x1x2x128xf32, #tpu.memory_space<vmem>>, %arg5: memref<2x1x2x128xf32, #tpu.memory_space<vmem>>) attributes {dimension_semantics = [#tpu.dimension_semantics<parallel>, #tpu.dimension_semantics<parallel>, #tpu.dimension_semantics<parallel>, #tpu.dimension_semantics<parallel>], iteration_bounds = array<i64: 1, 1, 1, 1>, scalar_prefetch = 0 : i64, scratch_operands = 0 : i64, tpu.core_type = #tpu.core_type<tc>, window_params = [{transform_indices = @transform_0, window_bounds = array<i64: 2, 1, 2, 128>}, {transform_indices = @transform_1, window_bounds = array<i64: 2, 1, 2, 128>}]} {
    %c0 = arith.constant 0 : index
    %c0_0 = arith.constant 0 : index
    %c0_1 = arith.constant 0 : index
    %c0_2 = arith.constant 0 : index
    %0 = vector.load %arg4[%c0, %c0_0, %c0_1, %c0_2] : memref<2x1x2x128xf32, #tpu.memory_space<vmem>>, vector<2x1x2x128xf32>
    %1 = vector.shape_cast %0 : vector<2x1x2x128xf32> to vector<2x2x128xf32>
    %c0_3 = arith.constant 0 : index
    %c0_4 = arith.constant 0 : index
    %c0_5 = arith.constant 0 : index
    %c0_6 = arith.constant 0 : index
    %2 = vector.load %arg5[%c0_3, %c0_4, %c0_5, %c0_6] : memref<2x1x2x128xf32, #tpu.memory_space<vmem>>, vector<2x1x2x128xf32>
    %3 = vector.shape_cast %2 : vector<2x1x2x128xf32> to vector<2x2x128xf32>
    %4 = vector.shape_cast %1 : vector<2x2x128xf32> to vector<2x1x2x128xf32>
    tpu.vector_store %arg5[%c0_3, %c0_4, %c0_5, %c0_6], %4 {strides = array<i32>} : memref<2x1x2x128xf32, #tpu.memory_space<vmem>>, vector<2x1x2x128xf32>,
    return
  }
  func.func @transform_0(%arg0: i32, %arg1: i32, %arg2: i32, %arg3: i32) -> (i32, i32, i32, i32) {
    %c0_i32 = arith.constant 0 : i32
    %0 = arith.addi %c0_i32, %arg0 : i32
    %c1_i32 = arith.constant 1 : i32
    %1 = arith.addi %c1_i32, %arg1 : i32
    %c0_i32_0 = arith.constant 0 : i32
    %2 = arith.addi %c0_i32_0, %arg2 : i32
    %c0_i32_1 = arith.constant 0 : i32
    %3 = arith.addi %c0_i32_1, %arg3 : i32
    %c0_i32_2 = arith.constant 0 : i32
    return %0, %1, %2, %3 : i32, i32, i32, i32
  }
  func.func @transform_1(%arg0: i32, %arg1: i32, %arg2: i32, %arg3: i32) -> (i32, i32, i32, i32) {
    %c0_i32 = arith.constant 0 : i32
    return %arg0, %arg1, %arg2, %arg3 : i32, i32, i32, i32
  }
}

</mosaic_0001>

<bundles_post_ra>
// kernel: _unnamed_function_.1
= control target key start
LH: loop header
LB: loop body
LE: loop exit
PB: predicated region body
PF: predicated region fallthrough
CT: control target
= control target key end

     0   :  { %s83_s0 = inlined_call_operand.vmem [shape: f32[2,4,2,128], index: 0, kind: input, shape index: {}]   ;;  %s84_s1 = inlined_call_operand.vmem [shape: f32[2,1,2,128], index: 1, kind: output, shape index: {}]  }
   0x1   :  { %v62_v0 = vld [vmem:[%s83_s0 + $0x2] sm:$0x3]  ;;  %v63_v1 = vld [vmem:[%s83_s0 + $0xa] sm:$0x3] }
   0x2   :  { %27 = vst [vmem:[#allocation2] sm:$0x3] %v62_v0  ;;  %29 = vst [vmem:[#allocation2 + $0x2] sm:$0x3] %v63_v1 }
   0x9   :  { %v49_v2 = vld [vmem:[#allocation2] sm:$0xf]  }
   0xa   :  { %51 = vst [vmem:[%s84_s1] sm:$0xf] %v49_v2  }

</bundles_post_ra>
